<compile_context>
chip_gen: v7x
topology: tpu7x:2x2x1
jax: 0.10.0
libtpu: 0.0.40
codegen_flags: <defaults>
</compile_context>

<pallas_src>
import functools

import jax
import jax.numpy as jnp
from jax.experimental import pallas as pl
from jax.experimental.pallas import tpu as pltpu


def _loss_kernel(*refs, weighted, loss_type, has_rank, neg_scale, inv_2lam,
                 inv_n, inv_nm1, true_b, tb, out_scale):
    """One batch-tile of BaseModel.loss_function (loss_type in {0, 2}).

    refs layout: pos (TB,1), neg (TB,N), [prob (TB,N)], [rank (TB,1)],
                 out (1,1), acc (1,1 VMEM scratch)
    """
    idx = 0
    pos_ref = refs[idx]; idx += 1
    neg_ref = refs[idx]; idx += 1
    prob_ref = None
    rank_ref = None
    if weighted:
        prob_ref = refs[idx]; idx += 1
    if has_rank:
        rank_ref = refs[idx]; idx += 1
    out_ref, acc_ref = refs[idx], refs[idx + 1]

    b = pl.program_id(0)

    @pl.when(b == 0)
    def _init():
        acc_ref[...] = jnp.zeros_like(acc_ref)

    pos = pos_ref[...].astype(jnp.float32)          # (TB, 1)
    neg = neg_ref[...].astype(jnp.float32)          # (TB, N)
    pred = pos - neg                                # broadcast -> (TB, N)

    # -logsigmoid(pred) == softplus(-pred), numerically stable form.
    z = jnp.maximum(-pred, 0.0) + jnp.log1p(jnp.exp(-jnp.abs(pred)))

    if weighted:
        prob = prob_ref[...].astype(jnp.float32)
        if loss_type == 0:
            # importance = softmax(-pred / lambda_w - neg_prob, dim=1)
            logits = pred * neg_scale - prob
        else:  # loss_type == 2: variance-derived temperature tau
            z_mean = jnp.sum(z, axis=-1, keepdims=True) * inv_n
            d = z - z_mean
            var = jnp.sum(d * d, axis=-1, keepdims=True) * inv_nm1  # unbiased
            inv_tau = 1.0 / jnp.sqrt(var * inv_2lam)                # (TB, 1)
            logits = z * inv_tau - prob
        # Fold the softmax normalization into the row reduction: one divide
        # per ROW, no (TB, N) `importance` temporary.
        m = jnp.max(logits, axis=-1, keepdims=True)
        e = jnp.exp(logits - m)
        row_num = jnp.sum(e * z, axis=-1, keepdims=True)             # (TB, 1)
        row_den = jnp.sum(e, axis=-1, keepdims=True)                 # (TB, 1)
        row = row_num / row_den
    else:
        # softmax(ones_like(pred)) is exactly uniform 1/N -> no softmax needed.
        row = jnp.sum(z, axis=-1, keepdims=True) * inv_n

    if has_rank:
        # pos_rank is a per-positive-sample weight -> applied per row.
        row = row * rank_ref[...].astype(jnp.float32)

    # Mask out rows of the (possibly partial) last block: Pallas pads the
    # out-of-bounds region with garbage, we zero it before accumulating.
    row_idx = b * tb + jax.lax.broadcasted_iota(jnp.int32, (tb, 1), 0)
    row = jnp.where(row_idx < true_b, row, 0.0)

    acc_ref[...] += jnp.sum(row, axis=0, keepdims=True)

    @pl.when(b == pl.num_programs(0) - 1)
    def _finalize():
        out_ref[...] = acc_ref[...] * out_scale      # out_scale = 1/B if mean

    # TODO(synk): loss_type=1 (torch.topk over negatives) is not implemented
    # in-kernel (in-lane top-k has no clean Pallas equivalent here).


def _round_up(x, m):
    return ((x + m - 1) // m) * m


def _pick_block_rows(batch, n, itemsize, n_big_inputs, override=None):
    """Tile rows so double-buffered (TB,N) inputs plus the f32 temporaries
    stay well under the scoped-VMEM default on v5e/v6e/v7x."""
    if override is not None:
        return max(8, (override // 8) * 8)
    budget = 16 << 20
    bytes_per_row = n_big_inputs * 2 * n * itemsize + 8 * n * 4   # 2 = dbl buf
    cap = max(8, (budget // max(1, bytes_per_row)) // 8 * 8)
    return min(_round_up(batch, 8), cap)


def basemodel_loss(pos_rat, neg_rat, neg_prob=None, *, weighted=False,
                   lambda_w=1.0, loss_type=0, pos_rank=None,
                   reduction=False, block_rows=None):
    """Pallas implementation of BaseModel.loss_function (loss_type 0 / 2)."""
    if loss_type == 1:
        raise NotImplementedError("loss_type=1 (topk) not implemented")  # TODO(synk)
    if weighted and neg_prob is None:
        raise ValueError("weighted=True requires neg_prob")

    B, N = neg_rat.shape
    in_dtype = neg_rat.dtype                    # bf16 welcome; cast in-kernel
    itemsize = jnp.dtype(in_dtype).itemsize
    n_big = 2 if weighted else 1                # (TB,N)-sized inputs

    tb = _pick_block_rows(B, N, itemsize, n_big, block_rows)
    num_blocks = pl.cdiv(B, tb)                 # partial last block is masked

    pos2 = pos_rat.reshape(B, 1)
    inputs = [pos2, neg_rat]
    in_specs = [
        pl.BlockSpec((tb, 1), lambda b: (b, 0)),
        pl.BlockSpec((tb, N), lambda b: (b, 0)),
    ]
    if weighted:
        inputs.append(neg_prob)
        in_specs.append(pl.BlockSpec((tb, N), lambda b: (b, 0)))
    has_rank = pos_rank is not None
    if has_rank:
        inputs.append(pos_rank.reshape(B, 1))
        in_specs.append(pl.BlockSpec((tb, 1), lambda b: (b, 0)))

    kernel = functools.partial(
        _loss_kernel,
        weighted=weighted,
        loss_type=int(loss_type),
        has_rank=has_rank,
        neg_scale=-1.0 / float(lambda_w),
        inv_2lam=1.0 / (2.0 * float(lambda_w)),
        inv_n=1.0 / N,
        inv_nm1=(1.0 / (N - 1)) if N > 1 else 1.0,
        true_b=B,
        tb=tb,
        out_scale=(1.0 / B) if reduction else 1.0,
    )

    out = pl.pallas_call(
        kernel,
        out_shape=jax.ShapeDtypeStruct((1, 1), jnp.float32),
        grid=(num_blocks,),
        in_specs=in_specs,
        out_specs=pl.BlockSpec((1, 1), lambda b: (0, 0)),
        scratch_shapes=[pltpu.VMEM((1, 1), jnp.float32)],
        compiler_params=pltpu.CompilerParams(
            dimension_semantics=("arbitrary",),
            vmem_limit_bytes=32 << 20,
        ),
    )(*inputs)
    return out[0, 0]


def _ref_loss(pos_rat, neg_rat, neg_prob=None, *, weighted=False,
              lambda_w=1.0, loss_type=0, pos_rank=None, reduction=False):
    """Pure-JAX reference mirroring the PyTorch loss_function semantics."""
    pred = pos_rat.astype(jnp.float32)[:, None] - neg_rat.astype(jnp.float32)
    z = jnp.maximum(-pred, 0.0) + jnp.log1p(jnp.exp(-jnp.abs(pred)))
    if weighted:
        if loss_type == 0:
            importance = jax.nn.softmax(-pred / lambda_w - neg_prob, axis=1)
        else:  # loss_type == 2
            var = jnp.var(z, axis=1, keepdims=True, ddof=1)
            tau = jnp.sqrt(var / (2.0 * lambda_w))
            importance = jax.nn.softmax(z / tau - neg_prob, axis=1)
    else:
        importance = jax.nn.softmax(jnp.ones_like(pred), axis=1)
    if pos_rank is not None:
        importance = importance * pos_rank.reshape(-1, 1)
    row = jnp.sum(importance * z, axis=-1)
    return jnp.mean(row) if reduction else jnp.sum(row)


if __name__ == "__main__":
    key = jax.random.PRNGKey(0)
    k1, k2, k3, k4 = jax.random.split(key, 4)

    B, N = 8, 128  # batch of users, 128 sampled negatives (lane-aligned)
    pos_rat = jax.random.normal(k1, (B,), dtype=jnp.float32)
    neg_rat = jax.random.normal(k2, (B, N), dtype=jnp.float32)
    neg_prob = jax.random.normal(k3, (B, N), dtype=jnp.float32) * 0.1
    pos_rank = jax.random.uniform(k4, (B,), dtype=jnp.float32) + 0.5

    # Default path: weighted=False, loss_type=0, reduction=False (sum).
    out_default = basemodel_loss(pos_rat, neg_rat)
    jax.block_until_ready(out_default)
    ref_default = _ref_loss(pos_rat, neg_rat)
    assert jnp.allclose(out_default, ref_default, rtol=1e-5, atol=1e-5)

    # Weighted loss_type=0: importance = softmax(-pred / lambda_w - neg_prob).
    out_w0 = basemodel_loss(pos_rat, neg_rat, neg_prob,
                            weighted=True, lambda_w=2.0)
    jax.block_until_ready(out_w0)
    ref_w0 = _ref_loss(pos_rat, neg_rat, neg_prob, weighted=True, lambda_w=2.0)
    assert jnp.allclose(out_w0, ref_w0, rtol=1e-5, atol=1e-5)

    # Weighted loss_type=2: variance-derived temperature.
    out_w2 = basemodel_loss(pos_rat, neg_rat, neg_prob,
                            weighted=True, lambda_w=1.5, loss_type=2)
    jax.block_until_ready(out_w2)
    ref_w2 = _ref_loss(pos_rat, neg_rat, neg_prob,
                       weighted=True, lambda_w=1.5, loss_type=2)
    assert jnp.allclose(out_w2, ref_w2, rtol=1e-4, atol=1e-4)

    # pos_rank re-weighting + reduction=True (mean over batch).
    out_rank = basemodel_loss(pos_rat, neg_rat, pos_rank=pos_rank,
                              reduction=True)
    jax.block_until_ready(out_rank)
    ref_rank = _ref_loss(pos_rat, neg_rat, pos_rank=pos_rank, reduction=True)
    assert jnp.allclose(out_rank, ref_rank, rtol=1e-5, atol=1e-5)

    # Multi-block grid + ragged batch (B=13, 8-row tiles -> partial last block
    # handled purely by in-kernel masking, no wrapper-side padding copies).
    B2 = 13
    j1, j2, j3 = jax.random.split(jax.random.PRNGKey(1), 3)
    pos_b = jax.random.normal(j1, (B2,), dtype=jnp.float32)
    neg_b = jax.random.normal(j2, (B2, N), dtype=jnp.float32)
    prob_b = jax.random.normal(j3, (B2, N), dtype=jnp.float32) * 0.1
    out_tiled = basemodel_loss(pos_b, neg_b, prob_b, weighted=True,
                               lambda_w=1.5, block_rows=8)
    jax.block_until_ready(out_tiled)
    ref_tiled = _ref_loss(pos_b, neg_b, prob_b, weighted=True, lambda_w=1.5)
    assert jnp.allclose(out_tiled, ref_tiled, rtol=1e-5, atol=1e-5)

    # bf16 inputs: DMA'd as bf16, cast to f32 inside the kernel.
    pos_bf = pos_rat.astype(jnp.bfloat16)
    neg_bf = neg_rat.astype(jnp.bfloat16)
    out_bf = basemodel_loss(pos_bf, neg_bf)
    jax.block_until_ready(out_bf)
    ref_bf = _ref_loss(pos_bf.astype(jnp.float32), neg_bf.astype(jnp.float32))
    assert jnp.allclose(out_bf, ref_bf, rtol=1e-5, atol=1e-5)

    print("KERNEL_OK")
</pallas_src>

<mosaic_0001>
module attributes {stable_mosaic.version = 11 : i64} {
  func.func @_loss_kernel(%arg0: i32, %arg1: memref<8x1xf32, #tpu.memory_space<vmem>>, %arg2: memref<8x128xf32, #tpu.memory_space<vmem>>, %arg3: memref<1x1xf32, #tpu.memory_space<vmem>>, %arg4: memref<1x1xf32, #tpu.memory_space<vmem>>) attributes {dimension_semantics = [#tpu.dimension_semantics<arbitrary>], iteration_bounds = array<i64: 1>, scalar_prefetch = 0 : i64, scratch_operands = 1 : i64, tpu.core_type = #tpu.core_type<tc>, window_params = [{transform_indices = @transform_0, window_bounds = array<i64: 8, 1>}, {transform_indices = @transform_1, window_bounds = array<i64: 8, 128>}, {pipeline_mode = #tpu.pipeline_mode<synchronous>, transform_indices = @transform_2, window_bounds = array<i64: 1, 1>}]} {
    %c0_i32 = arith.constant 0 : i32
    %0 = arith.cmpi eq, %arg0, %c0_i32 : i32
    %1 = arith.extui %0 : i1 to i32
    %c0_i32_0 = arith.constant 0 : i32
    %2 = arith.cmpi ne, %1, %c0_i32_0 : i32
    scf.if %2 {
      %cst_17 = arith.constant 0.000000e+00 : f32
      %37 = vector.broadcast %cst_17 : f32 to vector<1x1xf32>
      %c0_18 = arith.constant 0 : index
      %c0_19 = arith.constant 0 : index
      %38 = vector.load %arg4[%c0_18, %c0_19] : memref<1x1xf32, #tpu.memory_space<vmem>>, vector<1x1xf32>
      tpu.vector_store %arg4[%c0_18, %c0_19], %37 {strides = array<i32>} : memref<1x1xf32, #tpu.memory_space<vmem>>, vector<1x1xf32>,
    } else {
    }
    %c0 = arith.constant 0 : index
    %c0_1 = arith.constant 0 : index
    %3 = vector.load %arg1[%c0, %c0_1] : memref<8x1xf32, #tpu.memory_space<vmem>>, vector<8x1xf32>
    %c0_2 = arith.constant 0 : index
    %c0_3 = arith.constant 0 : index
    %4 = vector.load %arg2[%c0_2, %c0_3] : memref<8x128xf32, #tpu.memory_space<vmem>>, vector<8x128xf32>
    %5 = vector.broadcast %3 : vector<8x1xf32> to vector<8x128xf32>
    %6 = arith.subf %5, %4 : vector<8x128xf32>
    %cst = arith.constant 0.000000e+00 : f32
    %7 = vector.broadcast %cst : f32 to vector<8x128xf32>
    %8 = arith.subf %7, %6 : vector<8x128xf32>
    %cst_4 = arith.constant 0.000000e+00 : f32
    %9 = vector.broadcast %cst_4 : f32 to vector<8x128xf32>
    %10 = arith.maximumf %8, %9 : vector<8x128xf32>
    %11 = math.absf %6 : vector<8x128xf32>
    %cst_5 = arith.constant 0.000000e+00 : f32
    %12 = vector.broadcast %cst_5 : f32 to vector<8x128xf32>
    %13 = arith.subf %12, %11 : vector<8x128xf32>
    %14 = math.exp %13 : vector<8x128xf32>
    %15 = math.log1p %14 : vector<8x128xf32>
    %16 = arith.addf %10, %15 : vector<8x128xf32>
    %cst_6 = arith.constant dense<0.000000e+00> : vector<8xf32>
    %17 = vector.multi_reduction <add>, %16, %cst_6 [1] : vector<8x128xf32> to vector<8xf32>
    %18 = vector.shape_cast %17 : vector<8xf32> to vector<8x1xf32>
    %cst_7 = arith.constant 7.812500e-03 : f32
    %19 = vector.broadcast %cst_7 : f32 to vector<8x1xf32>
    %20 = arith.mulf %18, %19 : vector<8x1xf32>
    %c8_i32 = arith.constant 8 : i32
    %21 = arith.muli %arg0, %c8_i32 : i32
    %22 = tpu.iota {dimensions = array<i32: 0>} : vector<8x1xi32>
    %23 = vector.broadcast %21 : i32 to vector<8x1xi32>
    %24 = arith.addi %23, %22 : vector<8x1xi32>
    %c8_i32_8 = arith.constant 8 : i32
    %25 = vector.broadcast %c8_i32_8 : i32 to vector<8x1xi32>
    %26 = arith.cmpi slt, %24, %25 : vector<8x1xi32>
    %cst_9 = arith.constant 0.000000e+00 : f32
    %27 = vector.broadcast %cst_9 : f32 to vector<8x1xf32>
    %28 = arith.select %26, %20, %27 : vector<8x1xi1>, vector<8x1xf32>
    %c0_10 = arith.constant 0 : index
    %c0_11 = arith.constant 0 : index
    %29 = vector.load %arg4[%c0_10, %c0_11] : memref<1x1xf32, #tpu.memory_space<vmem>>, vector<1x1xf32>
    %cst_12 = arith.constant dense<0.000000e+00> : vector<1xf32>
    %30 = vector.multi_reduction <add>, %28, %cst_12 [0] : vector<8x1xf32> to vector<1xf32>
    %31 = vector.shape_cast %30 : vector<1xf32> to vector<1x1xf32>
    %32 = arith.addf %29, %31 : vector<1x1xf32>
    %c0_13 = arith.constant 0 : index
    %c0_14 = arith.constant 0 : index
    %33 = vector.load %arg4[%c0_13, %c0_14] : memref<1x1xf32, #tpu.memory_space<vmem>>, vector<1x1xf32>
    tpu.vector_store %arg4[%c0_13, %c0_14], %32 {strides = array<i32>} : memref<1x1xf32, #tpu.memory_space<vmem>>, vector<1x1xf32>,
    %c0_i32_15 = arith.constant 0 : i32
    %34 = arith.cmpi eq, %arg0, %c0_i32_15 : i32
    %35 = arith.extui %34 : i1 to i32
    %c0_i32_16 = arith.constant 0 : i32
    %36 = arith.cmpi ne, %35, %c0_i32_16 : i32
    scf.if %36 {
      %c0_17 = arith.constant 0 : index
      %c0_18 = arith.constant 0 : index
      %37 = vector.load %arg4[%c0_17, %c0_18] : memref<1x1xf32, #tpu.memory_space<vmem>>, vector<1x1xf32>
      %cst_19 = arith.constant 1.000000e+00 : f32
      %38 = vector.broadcast %cst_19 : f32 to vector<1x1xf32>
      %39 = arith.mulf %37, %38 : vector<1x1xf32>
      %c0_20 = arith.constant 0 : index
      %c0_21 = arith.constant 0 : index
      %40 = vector.load %arg3[%c0_20, %c0_21] : memref<1x1xf32, #tpu.memory_space<vmem>>, vector<1x1xf32>
      tpu.vector_store %arg3[%c0_20, %c0_21], %39 {strides = array<i32>} : memref<1x1xf32, #tpu.memory_space<vmem>>, vector<1x1xf32>,
    } else {
    }
    return
  }
  func.func @transform_0(%arg0: i32) -> (i32, i32) {
    %c0_i32 = arith.constant 0 : i32
    %c0_i32_0 = arith.constant 0 : i32
    return %arg0, %c0_i32 : i32, i32
  }
  func.func @transform_1(%arg0: i32) -> (i32, i32) {
    %c0_i32 = arith.constant 0 : i32
    %c0_i32_0 = arith.constant 0 : i32
    return %arg0, %c0_i32 : i32, i32
  }
  func.func @transform_2(%arg0: i32) -> (i32, i32) {
    %c0_i32 = arith.constant 0 : i32
    %c0_i32_0 = arith.constant 0 : i32
    %c0_i32_1 = arith.constant 0 : i32
    return %c0_i32, %c0_i32_0 : i32, i32
  }
}

</mosaic_0001>

<bundles_post_ra>
// kernel: tpu_custom_call.1
= control target key start
LH: loop header
LB: loop body
LE: loop exit
PB: predicated region body
PF: predicated region fallthrough
CT: control target
= control target key end

     0   :  { %s152_s0 = inlined_call_operand.vmem [shape: f32[8,1], index: 0, kind: input, shape index: {}]   ;;  %s153_s1 = inlined_call_operand.vmem [shape: f32[8,128], index: 1, kind: input, shape index: {}]   ;;  %s154_s2 = inlined_call_operand.hbm [shape: f32[1,1], index: 2, kind: output, shape index: {}]  }
   0x1   :  { %v18_v0 = vld [vmem:[%s152_s0] sm:$0xff] }
   0x2   :  { %7 = vsyncpa [#allocation4], 0  ;;  %v113_v1 = vmov 0   ;;  %v19_v2 = vld [vmem:[%s153_s1] sm:$0xff]  ;;  %vm16_vm1 = vcmask 0   ;;  %v114_v20 = vmov 0.0  }
   0x3   :  { %84 = vset.pattern.permute.xlu0 %v113_v1  ;;  %17 = vst.msk [vmem:[#allocation2] sm:$0x1] %vm16_vm1, %v114_v20  ;;  %s115_s0 = smov [#allocation3]  }
   0x4   :  { %22 = vperm.xlu0 %84, %v18_v0   ;;  %s73_s1 = sshll.u32 %s115_s0, 4  ;;  %s74_s1 = int_to_ptr.vmem [resolvable:$true] %s73_s1 }
   0x5   :  { %s89_s13 = scalar_lea.vmem %s74_s1, 16  ;;  %s93_s14 = scalar_lea.vmem %s74_s1, 32 }
   0x6   :  { %p90_p0 = scmp.ne.s32.totalorder %s74_s1, %s89_s13  ;;  %p94_p1 = scmp.lt.s32.totalorder %s74_s1, %s74_s1 }
   0x7   :  { %p95_p2 = scmp.lt.s32.totalorder %s93_s14, %s89_s13 }
   0x9   :  { %p96_p3 = por %p95_p2, %p94_p1 }
   0xa   :  { %v52_v28 = vld [vmem:[#allocation2] sm:$0x1] }
   0xb   :  { %p97_p4 = pnand %p96_p3, %p90_p0 }
  0x83   :  { %v23_v3 = vpop.permute.xlu0 %22 }
  0x84   :  { %v25_v4 = vsub.f32 %v23_v3, %v19_v2 }
  0x86   :  { %v28_v5 = vand.u32 2147483647, %v25_v4  ;;  %v26_v12 = vsub.f32 0.0, %v25_v4 }
  0x88   :  { %v29_v6 = vsub.f32 0.0, %v28_v5  ;;  %v27_v17 = vmax.f32 %v26_v12, 0.0 }
  0x8a   :  { %v30_v7 = vmul.f32 1.442695, %v29_v6 }
  0x8c   :  { %85 = vpow2.f32 %v30_v7 }
  0x96   :  { %v86_v8 = vpop.eup %85 }
  0x97   :  { %v32_v9 = vadd.f32 1.0, %v86_v8  ;;  %v35_v10 = vmul.f32 -0.5, %v86_v8  ;;  %v38_v13 = vand.u32 2147483647, %v86_v8 }
  0x99   :  { %87 = vlog2.f32 %v32_v9  ;;  %v36_v11 = vadd.f32 1.0, %v35_v10  ;;  %vm39_vm0 = vcmp.lt.f32.partialorder %v38_v13, 0.0004427343 }
  0x9b   :  { %v37_v16 = vmul.f32 %v86_v8, %v36_v11 }
  0xa3   :  { %v88_v14 = vpop.eup %87 }
  0xa4   :  { %v34_v15 = vmul.f32 0.6931472, %v88_v14 }
  0xa6   :  { %v40_v18 = vsel %vm39_vm0, %v37_v16, %v34_v15 }
  0xa7   :  { %v41_v19 = vadd.f32 %v40_v18, %v27_v17 }
  0xa9   :  { %42 = vadd.xlane.f32.xlu0 %v41_v19 }
 0x136   :  { %v43_v21 = vpop.xlane.xlu0 %42 }
 0x137   :  { %v44_v22 = vmul.f32 0.0078125, %v43_v21 }
 0x139   :  { %v53_v23 = vrot.slane %v44_v22, 4 }
 0x13b   :  { %v54_v24 = vadd.f32 %v53_v23, %v44_v22 }
 0x13d   :  { %v55_v25 = vrot.slane %v54_v24, 2 }
 0x13f   :  { %v56_v26 = vadd.f32 %v55_v25, %v54_v24 }
 0x141   :  { %v57_v27 = vrot.slane %v56_v26, 1 }
 0x143   :  { %v58_v29 = vadd.f32 %v57_v27, %v56_v26 }
 0x145   :  { %v59_v30 = vadd.f32 %v58_v29, %v52_v28 }
 0x147   :  { %61 = vst.msk [vmem:[#allocation2] sm:$0x1] %vm16_vm1, %v59_v30 }
 0x14e   :  { %v65_v31 = vld [vmem:[#allocation2] sm:$0x1] }
 0x14f   :  { %66 = vst.msk [vmem:[#allocation3] sm:$0x1] %vm16_vm1, %v65_v31 }
 0x150   :  { %100 = shalt.err (!%p97_p4)
}
 0x151   :  { %s101_s17 = scalar_lea.hbm %s154_s2, 16 }
 0x152   :  { %p102_p5 = scmp.ne.s32.totalorder %s154_s2, %s101_s17  ;;  %p105_p6 = scmp.lt.u32.totalorder %s101_s17, %s154_s2 }
 0x154   :  { %p107_p7 = pnand %p105_p6, %p102_p5 }
 0x156   :  { %110 = shalt.err (!%p107_p7)
}
 0x157   :  { %76 = dma.vmem_to_hbm [thread:$0]  %s74_s1, 16, %s154_s2, [#allocation4]  }
 0x158   :  { %111 = dma.done.wait [#allocation4], 16  }
 0x159   :  { %112 = vsyncadd [#allocation4], 4294967280 }
 0x15a   :  { %80 = vsyncpa [#allocation4], 1 }

</bundles_post_ra>
